<compile_context>
chip_gen: v7x
topology: tpu7x:2x2x1
jax: 0.10.0
libtpu: 0.0.40
codegen_flags: <defaults>
</compile_context>

<pallas_src>
import functools

import jax
import jax.numpy as jnp
from jax import lax
from jax.experimental import pallas as pl
from jax.experimental.pallas import tpu as pltpu


# -----------------------------------------------------------------------------
# Fused kernel: conv1 -> relu -> conv2 -> relu -> conv3 -> BN(train) -> relu.
# Everything (x, A_hat, all packed weights) is VMEM-resident; no grid.
# -----------------------------------------------------------------------------
def _fused_gnn_arma_kernel(
    x_ref, a_ref,
    w0_1_ref, wbd_1_ref, b0_1_ref, b1_1_ref,
    w0_2_ref, wbd_2_ref, b0_2_ref, b1_2_ref,
    w0_3_ref, wbd_3_ref, b0_3_ref, b1_3_ref,
    gamma_ref, beta_ref,
    o_ref,
    *, num_stacks, fo1, fo2, fo3):
  K = num_stacks
  inv_k = 1.0 / K

  xv = x_ref[...]          # [N, Fi]
  Av = a_ref[...]          # [N, N]

  def arma_layer(h_in, w0, wbd, b0, b1, fo):
    kf = K * fo
    # One MXU pass covers x@init_w, x@root_w[0], x@root_w[1] (same LHS, the
    # three weights are lane-concatenated in the wrapper).
    z = jnp.dot(h_in, w0, preferred_element_type=jnp.float32)   # [N, 3*K*fo]
    h0 = z[:, 0:kf]
    r0 = z[:, kf:2 * kf]
    r1 = z[:, 2 * kf:3 * kf]
    # t = 0
    h = jnp.dot(Av, h0, preferred_element_type=jnp.float32) + r0 + b0
    h = jnp.maximum(h, 0.0)                                      # ARMA act
    # t = 1 : per-stack weight applied via block-diagonal [K*fo, K*fo]
    h = jnp.dot(h, wbd, preferred_element_type=jnp.float32)
    h = jnp.dot(Av, h, preferred_element_type=jnp.float32) + r1 + b1
    h = jnp.maximum(h, 0.0)
    # mean over the K stacks (lane blocks)
    acc = h[:, 0:fo]
    for k in range(1, K):
      acc = acc + h[:, k * fo:(k + 1) * fo]
    return acc * inv_k

  h = arma_layer(xv, w0_1_ref[...], wbd_1_ref[...],
                 b0_1_ref[...], b1_1_ref[...], fo1)
  h = jnp.maximum(h, 0.0)                                        # F.relu
  h = arma_layer(h, w0_2_ref[...], wbd_2_ref[...],
                 b0_2_ref[...], b1_2_ref[...], fo2)
  h = jnp.maximum(h, 0.0)                                        # F.relu
  h = arma_layer(h, w0_3_ref[...], wbd_3_ref[...],
                 b0_3_ref[...], b1_3_ref[...], fo3)

  # BatchNorm1d (training-mode batch stats, biased variance) + ReLU.
  mean = jnp.mean(h, axis=0, keepdims=True)                      # [1, C]
  var = jnp.mean((h - mean) ** 2, axis=0, keepdims=True)
  y = (h - mean) * lax.rsqrt(var + 1e-5) * gamma_ref[...] + beta_ref[...]
  o_ref[...] = jnp.maximum(y, 0.0)


# -----------------------------------------------------------------------------
# Parameter packing: stacks packed along the lane (feature) axis.
# -----------------------------------------------------------------------------
def pack_arma_params(init_w, weight, root_w, bias):
  """init_w:[K,Fi,Fo], weight:[K,Fo,Fo], root_w:[2,K,Fi,Fo], bias:[2,K,1,Fo]
  ->  w0:[Fi,3*K*Fo] (init|root0|root1), wbd:[K*Fo,K*Fo] block-diag,
      b0,b1:[1,K*Fo]."""
  K, fi, fo = init_w.shape

  def lane_pack(w):                                   # [K, fi, fo] -> [fi, K*fo]
    return jnp.transpose(w, (1, 0, 2)).reshape(w.shape[1], K * fo)

  w0 = jnp.concatenate(
      [lane_pack(init_w), lane_pack(root_w[0]), lane_pack(root_w[1])], axis=-1)
  wbd = jnp.zeros((K * fo, K * fo), weight.dtype)
  for k in range(K):
    wbd = wbd.at[k * fo:(k + 1) * fo, k * fo:(k + 1) * fo].set(weight[k])
  b0 = jnp.transpose(bias[0], (1, 0, 2)).reshape(1, K * fo)
  b1 = jnp.transpose(bias[1], (1, 0, 2)).reshape(1, K * fo)
  return w0, wbd, b0, b1


# -----------------------------------------------------------------------------
# Dense normalized adjacency (gcn_norm, add_self_loops=False) — XLA pre-pass.
# -----------------------------------------------------------------------------
def build_norm_adj(edge_index, edge_weight, num_nodes):
  row = edge_index[0]   # source
  col = edge_index[1]   # target
  deg = jnp.zeros((num_nodes,), jnp.float32).at[col].add(edge_weight)
  deg_inv_sqrt = jnp.where(deg > 0, 1.0 / jnp.sqrt(deg), 0.0)
  norm = deg_inv_sqrt[row] * edge_weight * deg_inv_sqrt[col]
  a = jnp.zeros((num_nodes, num_nodes), jnp.float32).at[col, row].add(norm)
  return a   # out = A @ x aggregates messages at targets


# -----------------------------------------------------------------------------
# Forward wrapper: single fused pallas_call, no grid, everything in VMEM.
# -----------------------------------------------------------------------------
def gnn_arma_forward(x, edge_index, weights, params, *, num_stacks):
  N, _ = x.shape
  a_hat = build_norm_adj(edge_index, weights, N)
  # TODO(synk): for large N, tile A_hat over node rows with a leading
  # "parallel" grid axis and cast it to bf16 (v7x: 64 MiB VMEM, 2 TCs).
  p1 = pack_arma_params(*params["conv1"])
  p2 = pack_arma_params(*params["conv2"])
  p3 = pack_arma_params(*params["conv3"])
  fo1 = params["conv1"][0].shape[-1]
  fo2 = params["conv2"][0].shape[-1]
  fo3 = params["conv3"][0].shape[-1]

  kern = functools.partial(_fused_gnn_arma_kernel, num_stacks=num_stacks,
                           fo1=fo1, fo2=fo2, fo3=fo3)
  args = (x, a_hat, *p1, *p2, *p3, params["bn_gamma"], params["bn_beta"])
  vmem_specs = [pl.BlockSpec(memory_space=pltpu.MemorySpace.VMEM)
                for _ in args]
  return pl.pallas_call(
      kern,
      out_shape=jax.ShapeDtypeStruct((N, fo3), jnp.float32),
      in_specs=vmem_specs,
      out_specs=pl.BlockSpec(memory_space=pltpu.MemorySpace.VMEM),
  )(*args)


# -----------------------------------------------------------------------------
# Deterministic parameter construction (shapes match the PyTorch module).
# -----------------------------------------------------------------------------
def make_arma_params(key, fin, fout, num_stacks, num_layers):
  K, T = num_stacks, num_layers
  k1, k2, k3, k4 = jax.random.split(key, 4)
  scale_i = (6.0 / (fin + fout)) ** 0.5
  scale_w = (6.0 / (fout + fout)) ** 0.5
  init_w = jax.random.uniform(k1, (K, fin, fout), jnp.float32, -scale_i, scale_i)
  weight = jax.random.uniform(k2, (max(1, T - 1), K, fout, fout),
                              jnp.float32, -scale_w, scale_w)[0]
  root_w = jax.random.uniform(k3, (T, K, fin, fout), jnp.float32,
                              -scale_i, scale_i)
  bias = 0.01 * jax.random.normal(k4, (T, K, 1, fout), jnp.float32)
  return init_w, weight, root_w, bias


# -----------------------------------------------------------------------------
if __name__ == "__main__":
  N = 32            # nodes
  E = 64            # edges
  IN_C = 8
  HIDDEN_C = 16
  OUT_C = 8
  NUM_STACKS = 3
  NUM_LAYERS = 2

  key = jax.random.PRNGKey(0)
  kx, ke, kw, kp1, kp2, kp3 = jax.random.split(key, 6)

  x = jax.random.normal(kx, (N, IN_C), jnp.float32)
  edge_index = jax.random.randint(ke, (2, E), 0, N, jnp.int32)
  edge_weights = jax.random.uniform(kw, (E,), jnp.float32, 0.5, 1.5)

  params = {
      "conv1": make_arma_params(kp1, IN_C, HIDDEN_C, NUM_STACKS, NUM_LAYERS),
      "conv2": make_arma_params(kp2, HIDDEN_C, HIDDEN_C, NUM_STACKS, NUM_LAYERS),
      "conv3": make_arma_params(kp3, HIDDEN_C, OUT_C, NUM_STACKS, NUM_LAYERS),
      "bn_gamma": jnp.ones((1, OUT_C), jnp.float32),
      "bn_beta": jnp.zeros((1, OUT_C), jnp.float32),
  }

  fwd = jax.jit(functools.partial(gnn_arma_forward, num_stacks=NUM_STACKS))
  out = fwd(x, edge_index, edge_weights, params)
  jax.block_until_ready(out)
  assert out.shape == (N, OUT_C)
  print("KERNEL_OK")
</pallas_src>

<mosaic_0001>
module attributes {stable_mosaic.version = 11 : i64} {
  func.func private @main(%arg0: i32) attributes {dimension_semantics = [#tpu.dimension_semantics<core_parallel>], iteration_bounds = array<i64: 2>, tpu.core_type = #tpu.core_type<sc_scalar_subcore>, window_params = []} {
    return
  }
}

module attributes {stable_mosaic.version = 11 : i64} {
  func.func private @main(%arg0: i32) attributes {dimension_semantics = [#tpu.dimension_semantics<core_parallel>], iteration_bounds = array<i64: 2>, tpu.core_type = #tpu.core_type<sc_scalar_subcore>, window_params = []} {
    return
  }
}

module attributes {stable_mosaic.version = 11 : i64} {
  func.func @_fused_gnn_arma_kernel(%arg0: memref<32x8xf32, #tpu.memory_space<vmem>>, %arg1: memref<32x32xf32, #tpu.memory_space<vmem>>, %arg2: memref<8x144xf32, #tpu.memory_space<vmem>>, %arg3: memref<48x48xf32, #tpu.memory_space<vmem>>, %arg4: memref<1x48xf32, #tpu.memory_space<vmem>>, %arg5: memref<1x48xf32, #tpu.memory_space<vmem>>, %arg6: memref<16x144xf32, #tpu.memory_space<vmem>>, %arg7: memref<48x48xf32, #tpu.memory_space<vmem>>, %arg8: memref<1x48xf32, #tpu.memory_space<vmem>>, %arg9: memref<1x48xf32, #tpu.memory_space<vmem>>, %arg10: memref<16x72xf32, #tpu.memory_space<vmem>>, %arg11: memref<24x24xf32, #tpu.memory_space<vmem>>, %arg12: memref<1x24xf32, #tpu.memory_space<vmem>>, %arg13: memref<1x24xf32, #tpu.memory_space<vmem>>, %arg14: memref<1x8xf32, #tpu.memory_space<vmem>>, %arg15: memref<1x8xf32, #tpu.memory_space<vmem>>, %arg16: memref<32x8xf32, #tpu.memory_space<vmem>>) attributes {dimension_semantics = [], scalar_prefetch = 0 : i64, scratch_operands = 0 : i64, tpu.core_type = #tpu.core_type<tc>} {
    %c0 = arith.constant 0 : index
    %c0_0 = arith.constant 0 : index
    %0 = vector.load %arg0[%c0, %c0_0] : memref<32x8xf32, #tpu.memory_space<vmem>>, vector<32x8xf32>
    %c0_1 = arith.constant 0 : index
    %c0_2 = arith.constant 0 : index
    %1 = vector.load %arg1[%c0_1, %c0_2] : memref<32x32xf32, #tpu.memory_space<vmem>>, vector<32x32xf32>
    %c0_3 = arith.constant 0 : index
    %c0_4 = arith.constant 0 : index
    %2 = vector.load %arg2[%c0_3, %c0_4] : memref<8x144xf32, #tpu.memory_space<vmem>>, vector<8x144xf32>
    %c0_5 = arith.constant 0 : index
    %c0_6 = arith.constant 0 : index
    %3 = vector.load %arg3[%c0_5, %c0_6] : memref<48x48xf32, #tpu.memory_space<vmem>>, vector<48x48xf32>
    %c0_7 = arith.constant 0 : index
    %c0_8 = arith.constant 0 : index
    %4 = vector.load %arg4[%c0_7, %c0_8] : memref<1x48xf32, #tpu.memory_space<vmem>>, vector<1x48xf32>
    %c0_9 = arith.constant 0 : index
    %c0_10 = arith.constant 0 : index
    %5 = vector.load %arg5[%c0_9, %c0_10] : memref<1x48xf32, #tpu.memory_space<vmem>>, vector<1x48xf32>
    %cst = arith.constant dense<0.000000e+00> : vector<32x144xf32>
    %6 = tpu.matmul %0, %2, %cst {dimension_numbers = #tpu.dot_dimension_numbers<[1], [0], [0], [1], [0, 0, 1, 1], [], []>} : vector<32x8xf32>, vector<8x144xf32>, vector<32x144xf32> -> vector<32x144xf32>
    %7 = vector.extract_strided_slice %6 {offsets = [0, 0], sizes = [32, 48], strides = [1, 1]} : vector<32x144xf32> to vector<32x48xf32>
    %8 = vector.extract_strided_slice %6 {offsets = [0, 48], sizes = [32, 48], strides = [1, 1]} : vector<32x144xf32> to vector<32x48xf32>
    %9 = vector.extract_strided_slice %6 {offsets = [0, 96], sizes = [32, 48], strides = [1, 1]} : vector<32x144xf32> to vector<32x48xf32>
    %cst_11 = arith.constant dense<0.000000e+00> : vector<32x48xf32>
    %10 = tpu.matmul %1, %7, %cst_11 {dimension_numbers = #tpu.dot_dimension_numbers<[1], [0], [0], [1], [0, 0, 1, 1], [], []>} : vector<32x32xf32>, vector<32x48xf32>, vector<32x48xf32> -> vector<32x48xf32>
    %11 = arith.addf %10, %8 : vector<32x48xf32>
    %12 = vector.broadcast %4 : vector<1x48xf32> to vector<32x48xf32>
    %13 = arith.addf %11, %12 : vector<32x48xf32>
    %cst_12 = arith.constant 0.000000e+00 : f32
    %14 = vector.broadcast %cst_12 : f32 to vector<32x48xf32>
    %15 = arith.maximumf %13, %14 : vector<32x48xf32>
    %cst_13 = arith.constant dense<0.000000e+00> : vector<32x48xf32>
    %16 = tpu.matmul %15, %3, %cst_13 {dimension_numbers = #tpu.dot_dimension_numbers<[1], [0], [0], [1], [0, 0, 1, 1], [], []>} : vector<32x48xf32>, vector<48x48xf32>, vector<32x48xf32> -> vector<32x48xf32>
    %cst_14 = arith.constant dense<0.000000e+00> : vector<32x48xf32>
    %17 = tpu.matmul %1, %16, %cst_14 {dimension_numbers = #tpu.dot_dimension_numbers<[1], [0], [0], [1], [0, 0, 1, 1], [], []>} : vector<32x32xf32>, vector<32x48xf32>, vector<32x48xf32> -> vector<32x48xf32>
    %18 = arith.addf %17, %9 : vector<32x48xf32>
    %19 = vector.broadcast %5 : vector<1x48xf32> to vector<32x48xf32>
    %20 = arith.addf %18, %19 : vector<32x48xf32>
    %cst_15 = arith.constant 0.000000e+00 : f32
    %21 = vector.broadcast %cst_15 : f32 to vector<32x48xf32>
    %22 = arith.maximumf %20, %21 : vector<32x48xf32>
    %23 = vector.extract_strided_slice %22 {offsets = [0, 0], sizes = [32, 16], strides = [1, 1]} : vector<32x48xf32> to vector<32x16xf32>
    %24 = vector.extract_strided_slice %22 {offsets = [0, 16], sizes = [32, 16], strides = [1, 1]} : vector<32x48xf32> to vector<32x16xf32>
    %25 = arith.addf %23, %24 : vector<32x16xf32>
    %26 = vector.extract_strided_slice %22 {offsets = [0, 32], sizes = [32, 16], strides = [1, 1]} : vector<32x48xf32> to vector<32x16xf32>
    %27 = arith.addf %25, %26 : vector<32x16xf32>
    %cst_16 = arith.constant 0.333333343 : f32
    %28 = vector.broadcast %cst_16 : f32 to vector<32x16xf32>
    %29 = arith.mulf %27, %28 : vector<32x16xf32>
    %cst_17 = arith.constant 0.000000e+00 : f32
    %30 = vector.broadcast %cst_17 : f32 to vector<32x16xf32>
    %31 = arith.maximumf %29, %30 : vector<32x16xf32>
    %c0_18 = arith.constant 0 : index
    %c0_19 = arith.constant 0 : index
    %32 = vector.load %arg6[%c0_18, %c0_19] : memref<16x144xf32, #tpu.memory_space<vmem>>, vector<16x144xf32>
    %c0_20 = arith.constant 0 : index
    %c0_21 = arith.constant 0 : index
    %33 = vector.load %arg7[%c0_20, %c0_21] : memref<48x48xf32, #tpu.memory_space<vmem>>, vector<48x48xf32>
    %c0_22 = arith.constant 0 : index
    %c0_23 = arith.constant 0 : index
    %34 = vector.load %arg8[%c0_22, %c0_23] : memref<1x48xf32, #tpu.memory_space<vmem>>, vector<1x48xf32>
    %c0_24 = arith.constant 0 : index
    %c0_25 = arith.constant 0 : index
    %35 = vector.load %arg9[%c0_24, %c0_25] : memref<1x48xf32, #tpu.memory_space<vmem>>, vector<1x48xf32>
    %cst_26 = arith.constant dense<0.000000e+00> : vector<32x144xf32>
    %36 = tpu.matmul %31, %32, %cst_26 {dimension_numbers = #tpu.dot_dimension_numbers<[1], [0], [0], [1], [0, 0, 1, 1], [], []>} : vector<32x16xf32>, vector<16x144xf32>, vector<32x144xf32> -> vector<32x144xf32>
    %37 = vector.extract_strided_slice %36 {offsets = [0, 0], sizes = [32, 48], strides = [1, 1]} : vector<32x144xf32> to vector<32x48xf32>
    %38 = vector.extract_strided_slice %36 {offsets = [0, 48], sizes = [32, 48], strides = [1, 1]} : vector<32x144xf32> to vector<32x48xf32>
    %39 = vector.extract_strided_slice %36 {offsets = [0, 96], sizes = [32, 48], strides = [1, 1]} : vector<32x144xf32> to vector<32x48xf32>
    %cst_27 = arith.constant dense<0.000000e+00> : vector<32x48xf32>
    %40 = tpu.matmul %1, %37, %cst_27 {dimension_numbers = #tpu.dot_dimension_numbers<[1], [0], [0], [1], [0, 0, 1, 1], [], []>} : vector<32x32xf32>, vector<32x48xf32>, vector<32x48xf32> -> vector<32x48xf32>
    %41 = arith.addf %40, %38 : vector<32x48xf32>
    %42 = vector.broadcast %34 : vector<1x48xf32> to vector<32x48xf32>
    %43 = arith.addf %41, %42 : vector<32x48xf32>
    %cst_28 = arith.constant 0.000000e+00 : f32
    %44 = vector.broadcast %cst_28 : f32 to vector<32x48xf32>
    %45 = arith.maximumf %43, %44 : vector<32x48xf32>
    %cst_29 = arith.constant dense<0.000000e+00> : vector<32x48xf32>
    %46 = tpu.matmul %45, %33, %cst_29 {dimension_numbers = #tpu.dot_dimension_numbers<[1], [0], [0], [1], [0, 0, 1, 1], [], []>} : vector<32x48xf32>, vector<48x48xf32>, vector<32x48xf32> -> vector<32x48xf32>
    %cst_30 = arith.constant dense<0.000000e+00> : vector<32x48xf32>
    %47 = tpu.matmul %1, %46, %cst_30 {dimension_numbers = #tpu.dot_dimension_numbers<[1], [0], [0], [1], [0, 0, 1, 1], [], []>} : vector<32x32xf32>, vector<32x48xf32>, vector<32x48xf32> -> vector<32x48xf32>
    %48 = arith.addf %47, %39 : vector<32x48xf32>
    %49 = vector.broadcast %35 : vector<1x48xf32> to vector<32x48xf32>
    %50 = arith.addf %48, %49 : vector<32x48xf32>
    %cst_31 = arith.constant 0.000000e+00 : f32
    %51 = vector.broadcast %cst_31 : f32 to vector<32x48xf32>
    %52 = arith.maximumf %50, %51 : vector<32x48xf32>
    %53 = vector.extract_strided_slice %52 {offsets = [0, 0], sizes = [32, 16], strides = [1, 1]} : vector<32x48xf32> to vector<32x16xf32>
    %54 = vector.extract_strided_slice %52 {offsets = [0, 16], sizes = [32, 16], strides = [1, 1]} : vector<32x48xf32> to vector<32x16xf32>
    %55 = arith.addf %53, %54 : vector<32x16xf32>
    %56 = vector.extract_strided_slice %52 {offsets = [0, 32], sizes = [32, 16], strides = [1, 1]} : vector<32x48xf32> to vector<32x16xf32>
    %57 = arith.addf %55, %56 : vector<32x16xf32>
    %cst_32 = arith.constant 0.333333343 : f32
    %58 = vector.broadcast %cst_32 : f32 to vector<32x16xf32>
    %59 = arith.mulf %57, %58 : vector<32x16xf32>
    %cst_33 = arith.constant 0.000000e+00 : f32
    %60 = vector.broadcast %cst_33 : f32 to vector<32x16xf32>
    %61 = arith.maximumf %59, %60 : vector<32x16xf32>
    %c0_34 = arith.constant 0 : index
    %c0_35 = arith.constant 0 : index
    %62 = vector.load %arg10[%c0_34, %c0_35] : memref<16x72xf32, #tpu.memory_space<vmem>>, vector<16x72xf32>
    %c0_36 = arith.constant 0 : index
    %c0_37 = arith.constant 0 : index
    %63 = vector.load %arg11[%c0_36, %c0_37] : memref<24x24xf32, #tpu.memory_space<vmem>>, vector<24x24xf32>
    %c0_38 = arith.constant 0 : index
    %c0_39 = arith.constant 0 : index
    %64 = vector.load %arg12[%c0_38, %c0_39] : memref<1x24xf32, #tpu.memory_space<vmem>>, vector<1x24xf32>
    %c0_40 = arith.constant 0 : index
    %c0_41 = arith.constant 0 : index
    %65 = vector.load %arg13[%c0_40, %c0_41] : memref<1x24xf32, #tpu.memory_space<vmem>>, vector<1x24xf32>
    %cst_42 = arith.constant dense<0.000000e+00> : vector<32x72xf32>
    %66 = tpu.matmul %61, %62, %cst_42 {dimension_numbers = #tpu.dot_dimension_numbers<[1], [0], [0], [1], [0, 0, 1, 1], [], []>} : vector<32x16xf32>, vector<16x72xf32>, vector<32x72xf32> -> vector<32x72xf32>
    %67 = vector.extract_strided_slice %66 {offsets = [0, 0], sizes = [32, 24], strides = [1, 1]} : vector<32x72xf32> to vector<32x24xf32>
    %68 = vector.extract_strided_slice %66 {offsets = [0, 24], sizes = [32, 24], strides = [1, 1]} : vector<32x72xf32> to vector<32x24xf32>
    %69 = vector.extract_strided_slice %66 {offsets = [0, 48], sizes = [32, 24], strides = [1, 1]} : vector<32x72xf32> to vector<32x24xf32>
    %cst_43 = arith.constant dense<0.000000e+00> : vector<32x24xf32>
    %70 = tpu.matmul %1, %67, %cst_43 {dimension_numbers = #tpu.dot_dimension_numbers<[1], [0], [0], [1], [0, 0, 1, 1], [], []>} : vector<32x32xf32>, vector<32x24xf32>, vector<32x24xf32> -> vector<32x24xf32>
    %71 = arith.addf %70, %68 : vector<32x24xf32>
    %72 = vector.broadcast %64 : vector<1x24xf32> to vector<32x24xf32>
    %73 = arith.addf %71, %72 : vector<32x24xf32>
    %cst_44 = arith.constant 0.000000e+00 : f32
    %74 = vector.broadcast %cst_44 : f32 to vector<32x24xf32>
    %75 = arith.maximumf %73, %74 : vector<32x24xf32>
    %cst_45 = arith.constant dense<0.000000e+00> : vector<32x24xf32>
    %76 = tpu.matmul %75, %63, %cst_45 {dimension_numbers = #tpu.dot_dimension_numbers<[1], [0], [0], [1], [0, 0, 1, 1], [], []>} : vector<32x24xf32>, vector<24x24xf32>, vector<32x24xf32> -> vector<32x24xf32>
    %cst_46 = arith.constant dense<0.000000e+00> : vector<32x24xf32>
    %77 = tpu.matmul %1, %76, %cst_46 {dimension_numbers = #tpu.dot_dimension_numbers<[1], [0], [0], [1], [0, 0, 1, 1], [], []>} : vector<32x32xf32>, vector<32x24xf32>, vector<32x24xf32> -> vector<32x24xf32>
    %78 = arith.addf %77, %69 : vector<32x24xf32>
    %79 = vector.broadcast %65 : vector<1x24xf32> to vector<32x24xf32>
    %80 = arith.addf %78, %79 : vector<32x24xf32>
    %cst_47 = arith.constant 0.000000e+00 : f32
    %81 = vector.broadcast %cst_47 : f32 to vector<32x24xf32>
    %82 = arith.maximumf %80, %81 : vector<32x24xf32>
    %83 = vector.extract_strided_slice %82 {offsets = [0, 0], sizes = [32, 8], strides = [1, 1]} : vector<32x24xf32> to vector<32x8xf32>
    %84 = vector.extract_strided_slice %82 {offsets = [0, 8], sizes = [32, 8], strides = [1, 1]} : vector<32x24xf32> to vector<32x8xf32>
    %85 = arith.addf %83, %84 : vector<32x8xf32>
    %86 = vector.extract_strided_slice %82 {offsets = [0, 16], sizes = [32, 8], strides = [1, 1]} : vector<32x24xf32> to vector<32x8xf32>
    %87 = arith.addf %85, %86 : vector<32x8xf32>
    %cst_48 = arith.constant 0.333333343 : f32
    %88 = vector.broadcast %cst_48 : f32 to vector<32x8xf32>
    %89 = arith.mulf %87, %88 : vector<32x8xf32>
    %cst_49 = arith.constant dense<0.000000e+00> : vector<8xf32>
    %90 = vector.multi_reduction <add>, %89, %cst_49 [0] : vector<32x8xf32> to vector<8xf32>
    %91 = vector.shape_cast %90 : vector<8xf32> to vector<1x8xf32>
    %cst_50 = arith.constant 3.200000e+01 : f32
    %92 = vector.broadcast %cst_50 : f32 to vector<1x8xf32>
    %93 = arith.divf %91, %92 : vector<1x8xf32>
    %94 = vector.broadcast %93 : vector<1x8xf32> to vector<32x8xf32>
    %95 = arith.subf %89, %94 : vector<32x8xf32>
    %96 = arith.mulf %95, %95 : vector<32x8xf32>
    %cst_51 = arith.constant dense<0.000000e+00> : vector<8xf32>
    %97 = vector.multi_reduction <add>, %96, %cst_51 [0] : vector<32x8xf32> to vector<8xf32>
    %98 = vector.shape_cast %97 : vector<8xf32> to vector<1x8xf32>
    %cst_52 = arith.constant 3.200000e+01 : f32
    %99 = vector.broadcast %cst_52 : f32 to vector<1x8xf32>
    %100 = arith.divf %98, %99 : vector<1x8xf32>
    %101 = vector.broadcast %93 : vector<1x8xf32> to vector<32x8xf32>
    %102 = arith.subf %89, %101 : vector<32x8xf32>
    %cst_53 = arith.constant 9.99999974E-6 : f32
    %103 = vector.broadcast %cst_53 : f32 to vector<1x8xf32>
    %104 = arith.addf %100, %103 : vector<1x8xf32>
    %105 = math.rsqrt %104 : vector<1x8xf32>
    %106 = vector.broadcast %105 : vector<1x8xf32> to vector<32x8xf32>
    %107 = arith.mulf %102, %106 : vector<32x8xf32>
    %c0_54 = arith.constant 0 : index
    %c0_55 = arith.constant 0 : index
    %108 = vector.load %arg14[%c0_54, %c0_55] : memref<1x8xf32, #tpu.memory_space<vmem>>, vector<1x8xf32>
    %109 = vector.broadcast %108 : vector<1x8xf32> to vector<32x8xf32>
    %110 = arith.mulf %107, %109 : vector<32x8xf32>
    %c0_56 = arith.constant 0 : index
    %c0_57 = arith.constant 0 : index
    %111 = vector.load %arg15[%c0_56, %c0_57] : memref<1x8xf32, #tpu.memory_space<vmem>>, vector<1x8xf32>
    %112 = vector.broadcast %111 : vector<1x8xf32> to vector<32x8xf32>
    %113 = arith.addf %110, %112 : vector<32x8xf32>
    %cst_58 = arith.constant 0.000000e+00 : f32
    %114 = vector.broadcast %cst_58 : f32 to vector<32x8xf32>
    %115 = arith.maximumf %113, %114 : vector<32x8xf32>
    %c0_59 = arith.constant 0 : index
    %c0_60 = arith.constant 0 : index
    %116 = vector.load %arg16[%c0_59, %c0_60] : memref<32x8xf32, #tpu.memory_space<vmem>>, vector<32x8xf32>
    tpu.vector_store %arg16[%c0_59, %c0_60], %115 {strides = array<i32>} : memref<32x8xf32, #tpu.memory_space<vmem>>, vector<32x8xf32>,
    return
  }
}

</mosaic_0001>

<bundles_post_ra>
// kernel: squeeze.30
= control target key start
LH: loop header
LB: loop body
LE: loop exit
PB: predicated region body
PF: predicated region fallthrough
CT: control target
= control target key end

     0   :  { %vm7_vm0 = vcmask 130048   ;;  %s30_s8 = smov 16   ;;  %vm13_vm1 = vcmask 392448   ;;  %vm19_vm2 = vcmask 261248   ;;  %s47_s0 = inlined_call_operand.vmem [shape: f32[3,16], index: 0, kind: input, shape index: {}]   ;;  %s48_s1 = inlined_call_operand.vmem [shape: f32[1,48], index: 1, kind: output, shape index: {}]  }
   0x1   :  { %v4_v0 = vld [vmem:[%s47_s0] sm:$0xf]  ;;  %s29_s0 = smov 32  }
   0x2   :  { %5 = vst [vmem:[#allocation1] sm:$0xf] %v4_v0 }
   0x9   :  { %v10_v1 = vld [vmem:[#allocation1 + $0x2] sm:$0x1]   ;;  %v6_v2 = vld [vmem:[#allocation1] sm:$0x1]   ;;  %v16_v3 = vld [vmem:[#allocation1 + $0x1] sm:$0x1]  }
   0xa   :  { %11 = vrot.lane.b32.xlu0 %v10_v1, %s29_s0  ;;  %8 = vst.msk [vmem:[#allocation0] sm:$0x1] %vm7_vm0, %v6_v2  }
   0xe   :  { %17 = vrot.lane.b32.xlu0 %v16_v3, %s30_s8 }
  0x7c   :  { %v12_v4 = vpop.permute.xlu0 %11  }
  0x7d   :  { %14 = vst.msk [vmem:[#allocation0] sm:$0x1] %vm13_vm1, %v12_v4  }
  0x80   :  { %v18_v5 = vpop.permute.xlu0 %17  }
  0x81   :  { %20 = vst.msk [vmem:[#allocation0] sm:$0x1] %vm19_vm2, %v18_v5  }
  0x88   :  { %v24_v6 = vld [vmem:[#allocation0] sm:$0x1] }
  0x89   :  { %26 = vst [vmem:[%s48_s1] sm:$0x1] %v24_v6 }

// kernel: squeeze.44
= control target key start
LH: loop header
LB: loop body
LE: loop exit
PB: predicated region body
PF: predicated region fallthrough
CT: control target
= control target key end

     0   :  { %vm7_vm0 = vcmask 64512   ;;  %s30_s8 = smov 8   ;;  %vm13_vm1 = vcmask 195712   ;;  %vm19_vm2 = vcmask 130112   ;;  %s47_s0 = inlined_call_operand.vmem [shape: f32[3,8], index: 0, kind: input, shape index: {}]   ;;  %s48_s1 = inlined_call_operand.vmem [shape: f32[1,24], index: 1, kind: output, shape index: {}]  }
   0x1   :  { %v4_v0 = vld [vmem:[%s47_s0] sm:$0xf]  ;;  %s29_s0 = smov 16  }
   0x2   :  { %5 = vst [vmem:[#allocation1] sm:$0xf] %v4_v0 }
   0x9   :  { %v10_v1 = vld [vmem:[#allocation1 + $0x2] sm:$0x1]   ;;  %v6_v2 = vld [vmem:[#allocation1] sm:$0x1]   ;;  %v16_v3 = vld [vmem:[#allocation1 + $0x1] sm:$0x1]  }
   0xa   :  { %11 = vrot.lane.b32.xlu0 %v10_v1, %s29_s0  ;;  %8 = vst.msk [vmem:[#allocation0] sm:$0x1] %vm7_vm0, %v6_v2  }
   0xe   :  { %17 = vrot.lane.b32.xlu0 %v16_v3, %s30_s8 }
  0x7c   :  { %v12_v4 = vpop.permute.xlu0 %11  }
  0x7d   :  { %14 = vst.msk [vmem:[#allocation0] sm:$0x1] %vm13_vm1, %v12_v4  }
  0x80   :  { %v18_v5 = vpop.permute.xlu0 %17  }
  0x81   :  { %20 = vst.msk [vmem:[#allocation0] sm:$0x1] %vm19_vm2, %v18_v5  }
  0x88   :  { %v24_v6 = vld [vmem:[#allocation0] sm:$0x1] }
  0x89   :  { %26 = vst [vmem:[%s48_s1] sm:$0x1] %v24_v6 }

// kernel: gnn_arma_forward.1
= control target key start
LH: loop header
LB: loop body
LE: loop exit
PB: predicated region body
PF: predicated region fallthrough
CT: control target
= control target key end

     0   :  { %s2402_s0 = inlined_call_operand.vmem [shape: f32[32,8], index: 0, kind: input, shape index: {}]   ;;  %s2403_s1 = inlined_call_operand.hbm [shape: f32[32,32], index: 1, kind: input, shape index: {}]   ;;  %s2404_s2 = inlined_call_operand.vmem [shape: f32[8,144], index: 2, kind: input, shape index: {}]   ;;  %s2405_s3 = inlined_call_operand.vmem [shape: f32[48,48], index: 3, kind: input, shape index: {}]   ;;  %s2406_s4 = inlined_call_operand.vmem [shape: f32[1,48], index: 4, kind: input, shape index: {}]   ;;  %s2407_s5 = inlined_call_operand.vmem [shape: f32[1,48], index: 5, kind: input, shape index: {}]   ;;  %s2408_s6 = inlined_call_operand.vmem [shape: f32[16,144], index: 6, kind: input, shape index: {}]   ;;  %s2409_s7 = inlined_call_operand.vmem [shape: f32[48,48], index: 7, kind: input, shape index: {}]   ;;  %s2410_s8 = inlined_call_operand.vmem [shape: f32[1,48], index: 8, kind: input, shape index: {}]   ;;  %s2411_s9 = inlined_call_operand.vmem [shape: f32[1,48], index: 9, kind: input, shape index: {}]   ;;  %s2412_s10 = inlined_call_operand.vmem [shape: f32[16,72], index: 10, kind: input, shape index: {}]   ;;  %s2413_s11 = inlined_call_operand.vmem [shape: f32[24,24], index: 11, kind: input, shape index: {}]   ;;  %s2414_s12 = inlined_call_operand.vmem [shape: f32[1,24], index: 12, kind: input, shape index: {}]   ;;  %s2415_s13 = inlined_call_operand.vmem [shape: f32[1,24], index: 13, kind: input, shape index: {}]   ;;  %s2416_s14 = inlined_call_operand.vmem [shape: f32[1,8], index: 14, kind: input, shape index: {}]   ;;  %s2417_s15 = inlined_call_operand.vmem [shape: f32[1,8], index: 15, kind: input, shape index: {}]   ;;  %s2418_s16 = inlined_call_operand.vmem [shape: f32[32,8], index: 16, kind: output, shape index: {}]  }
   0x1   :  { %2420 = sst [smem:[#allocation5_spill]] %s2402_s0 }
   0x2   :  { %21 = vsyncpa [#allocation3], 0  ;;  %s2026_s21 = smov [#allocation2]   ;;  %s2002_s25 = scalar_lea.hbm %s2403_s1, 512 }
   0x3   :  { %s29_s22 = sshll.u32 %s2026_s21, 4  ;;  %p2003_p0 = scmp.ne.s32.totalorder %s2403_s1, %s2002_s25  ;;  %s30_s22 = int_to_ptr.vmem [resolvable:$true] %s29_s22 }
   0x4   :  { %p2006_p1 = scmp.lt.u32.totalorder %s2002_s25, %s2403_s1 }
   0x6   :  { %p2008_p2 = pnand %p2006_p1, %p2003_p0 }
   0x8   :  { %2011 = shalt.err (!%p2008_p2)
}
   0x9   :  { %s2012_s30 = scalar_lea.vmem %s30_s22, 512  ;;  %p2017_p4 = scmp.lt.s32.totalorder %s30_s22, %s30_s22 }
   0xa   :  { %p2013_p3 = scmp.ne.s32.totalorder %s30_s22, %s2012_s30  ;;  %p2018_p5 = scmp.lt.s32.totalorder %s2012_s30, %s2012_s30 }
   0xc   :  { %p2019_p6 = por %p2018_p5, %p2017_p4 }
   0xe   :  { %p2020_p7 = pnand %p2019_p6, %p2013_p3 }
  0x10   :  { %2023 = shalt.err (!%p2020_p7)
}
  0x11   :  { %s2027_s0 = smov 128   ;;  %s2028_s17 = smov 8  }
  0x12   :  { %35 = dma.hbm_to_vmem [thread:$0]  %s2403_s1, 512, %s30_s22, [#allocation3], %s2027_s0, %s2027_s0, %s2028_s17  }
  0x13   :  { %2024 = dma.done.wait [#allocation3], 512  }
  0x14   :  { %2025 = vsyncadd [#allocation3], 4294966784  ;;  %v2029_v0 = vmov 0.0   ;;  %v76_v1 = vld [vmem:[%s2404_s2 + $0x8] sm:$0xff]  ;;  %v75_v2 = vld [vmem:[%s2404_s2] sm:$0xff]  ;;  %s2421_s27 = sld [smem:[#allocation5_spill]] }
  0x15   :  { %162 = vmatprep.mubr.f32.mxu0 %v2029_v0  ;;  %vm85_vm0 = vcmask 64512   ;;  %98 = vmatprep.subr.mxu0 %v76_v1  ;;  %v2159_v7 = vld [vmem:[#allocation2] sm:$0xff]  ;;  %vm203_vm1 = vcmask 261120   ;;  %s2030_s0 = smov 80   ;;  %s2031_s17 = smov 32   ;;  %v78_v19 = vld [vmem:[%s2405_s3 + $0x8] sm:$0xff] }
  0x16   :  { %99 = vmatpush1.msra.mxu0 %v75_v2  ;;  %1772 = vmatprep.mubr.msk.f32.mxu1 %vm203_vm1, %v2159_v7  ;;  %v77_v18 = vld [vmem:[%s2405_s3] sm:$0xff]  ;;  %v2175_v20 = vld [vmem:[#allocation2 + $0x8] sm:$0xff]  ;;  %v2179_v22 = vld [vmem:[#allocation2 + $0x10] sm:$0xff]  ;;  %vm315_vm2 = vcmask 392192   ;;  %vm596_vm3 = vcmask 130048   ;;  %vm1300_vm4 = vcmask 195584  }
  0x17   :  { %v1914_v21 = vpack.c.bf16 %v78_v19, %v77_v18  ;;  %v2185_v23 = vld [vmem:[#allocation2 + $0x18] sm:$0xff]  ;;  %v79_v24 = vld [vmem:[%s2405_s3 + $0x10] sm:$0xff]  ;;  %v81_v27 = vld [vmem:[%s2405_s3 + $0x20] sm:$0xff]  ;;  %s2035_s28 = smov 120  }
  0x18   :  { %v80_v25 = vld [vmem:[%s2405_s3 + $0x18] sm:$0xff]  ;;  %v82_v28 = vld [vmem:[%s2405_s3 + $0x28] sm:$0xff]  ;;  %v1635_v33 = vld [vmem:[%s2406_s4] ss:$0 sm:$0xff] }
  0x19   :  { %1915 = vmatprep.subr.bf16.mxu0 %v1914_v21  ;;  %v1918_v26 = vpack.c.bf16 %v80_v25, %v79_v24  ;;  %v1922_v29 = vpack.c.bf16 %v82_v28, %v81_v27  ;;  %v585_v61 = vld [vmem:[%s2408_s6 + $0x8] sm:$0xff]  ;;  %v587_v62 = vld [vmem:[%s2408_s6 + $0x18] sm:$0xff]  ;;  %v584_v1 = vld [vmem:[%s2408_s6] sm:$0xff] }
  0x1a   :  { %v67_v3 = vld [vmem:[%s2421_s27] sm:$0xff]  ;;  %v68_v4 = vld [vmem:[%s2421_s27 + $0x8] sm:$0xff]  ;;  %v69_v5 = vld [vmem:[%s2421_s27 + $0x10] sm:$0xff]  ;;  %v1934_v63 = vpack.c.bf16 %v587_v62, %v585_v61 }
  0x1b   :  { %1627 = vmatmul.mubr.msk.f32.vlgmr.msra.gmra.mrb[0].mxu0 %vm85_vm0, %v67_v3  ;;  %v70_v6 = vld [vmem:[%s2421_s27 + $0x18] sm:$0xff]  ;;  %v586_v2 = vld [vmem:[%s2408_s6 + $0x10] sm:$0xff]  ;;  %s2032_s6 = smov 96  }
  0x1c   :  { %168 = vmatprep.mubr.f32.mxu0 %v2029_v0  ;;  %1917 = vmatpush3.bf16.msra.mxu0 %v1914_v21  ;;  %v1936_v3 = vpack.c.bf16 %v586_v2, %v584_v1 }
  0x1d   :  { %1919 = vmatprep.subr.bf16.mxu0 %v1918_v26 }
  0x1f   :  { %1628 = vmatmul.mubr.msk.f32.gmra.mrb[2].mxu0 %vm85_vm0, %v68_v4 }
  0x20   :  { %174 = vmatprep.mubr.f32.mxu0 %v2029_v0  ;;  %1921 = vmatpush3.bf16.msra.mxu0 %v1918_v26 }
  0x21   :  { %1923 = vmatprep.subr.bf16.mxu0 %v1922_v29 }
  0x23   :  { %1629 = vmatmul.mubr.msk.f32.gmra.mrb[4].mxu0 %vm85_vm0, %v69_v5 }
  0x24   :  { %180 = vmatprep.mubr.f32.mxu0 %v2029_v0  ;;  %1925 = vmatpush3.bf16.msra.mxu0 %v1922_v29 }
  0x27   :  { %1630 = vmatmul.mubr.msk.f32.gmra.mrb[6].mxu0 %vm85_vm0, %v70_v6  ;;  %v1644_v6 = vld [vmem:[%s2407_s5] ss:$0 sm:$0xff]  ;;  %s2033_s5 = smov 112  }
  0xee   :  { %v164_v8 = vpop.f32.mrb[0].mxu0 }
  0xef   :  { %191 = vrot.lane.b32.xlu0 %v164_v8, %s2030_s0  ;;  %v166_v9 = vpop.f32.mrb[1].mxu0 }
  0xf2   :  { %v170_v10 = vpop.f32.mrb[2].mxu0 }
  0xf3   :  { %193 = vrot.lane.b32.xlu0 %v170_v10, %s2030_s0  ;;  %v172_v11 = vpop.f32.mrb[3].mxu0  ;;  %v1906_v12 = vpack.c.bf16 %v170_v10, %v164_v8 }
  0xf5   :  { %1907 = vmatprep.subr.bf16.mxu1 %v1906_v12 }
  0xf6   :  { %v176_v13 = vpop.f32.mrb[4].mxu0  ;;  %1909 = vmatpush3.bf16.msra.mxu1 %v1906_v12 }
  0xf7   :  { %417 = vrot.lane.b32.xlu0 %v164_v8, %s2031_s17  ;;  %195 = vrot.lane.b32.xlu1 %v176_v13, %s2030_s0  ;;  %v178_v14 = vpop.f32.mrb[5].mxu0 }
  0xfa   :  { %v182_v15 = vpop.f32.mrb[6].mxu0 }
  0xfb   :  { %v1910_v16 = vpack.c.bf16 %v182_v15, %v176_v13  ;;  %421 = vrot.lane.b32.xlu0 %v170_v10, %s2031_s17  ;;  %197 = vrot.lane.b32.xlu1 %v182_v15, %s2030_s0  ;;  %v184_v17 = vpop.f32.mrb[7].mxu0 }
  0xfd   :  { %1911 = vmatprep.subr.bf16.mxu1 %v1910_v16 }
  0xfe   :  { %1913 = vmatpush3.bf16.msra.mxu1 %v1910_v16 }
  0xff   :  { %425 = vrot.lane.b32.xlu0 %v176_v13, %s2031_s17  ;;  %419 = vrot.lane.b32.xlu1 %v166_v9, %s2031_s17 }
 0x101   :  { %1773 = vmatmul.mubr.msk.f32.vlgmr.msra.gmra.mrb[0].mxu1 %vm203_vm1, %v2175_v20 }
 0x102   :  { %1775 = vmatprep.mubr.msk.f32.mxu1 %vm203_vm1, %v2179_v22 }
 0x103   :  { %429 = vrot.lane.b32.xlu0 %v182_v15, %s2031_s17  ;;  %423 = vrot.lane.b32.xlu1 %v172_v11, %s2031_s17 }
 0x105   :  { %1776 = vmatmul.mubr.msk.f32.gmra.mrb[2].mxu1 %vm203_vm1, %v2185_v23 }
 0x106   :  { %1804 = vmatprep.mubr.msk.f32.mxu1 %vm203_vm1, %v2159_v7 }
 0x107   :  { %427 = vrot.lane.b32.xlu1 %v178_v14, %s2031_s17 }
 0x10b   :  { %431 = vrot.lane.b32.xlu1 %v184_v17, %s2031_s17 }
 0x161   :  { %v192_v30 = vpop.permute.xlu0 %191 }
 0x165   :  { %v194_v32 = vpop.permute.xlu0 %193 }
 0x169   :  { %v196_v31 = vpop.permute.xlu1 %195  ;;  %v418_v58 = vpop.permute.xlu0 %417 }
 0x16d   :  { %v198_v39 = vpop.permute.xlu1 %197  ;;  %v422_v60 = vpop.permute.xlu0 %421 }
 0x171   :  { %v420_v57 = vpop.permute.xlu1 %419  ;;  %v426_v11 = vpop.permute.xlu0 %425 }
 0x172   :  { %v433_v9 = vsel %vm203_vm1, %v418_v58, %v420_v57 }
 0x175   :  { %v424_v59 = vpop.permute.xlu1 %423  ;;  %v430_v25 = vpop.permute.xlu0 %429 }
 0x176   :  { %v434_v8 = vsel %vm203_vm1, %v422_v60, %v424_v59 }
 0x179   :  { %v428_v4 = vpop.permute.xlu1 %427 }
 0x17a   :  { %v435_v16 = vsel %vm203_vm1, %v426_v11, %v428_v4  ;;  %v589_v4 = vld [vmem:[%s2409_s7 + $0x8] sm:$0xff] }
 0x17b   :  { %v593_v11 = vld [vmem:[%s2409_s7 + $0x28] sm:$0xff] }
 0x17d   :  { %v432_v18 = vpop.permute.xlu1 %431 }
 0x17e   :  { %v436_v26 = vsel %vm203_vm1, %v430_v25, %v432_v18 }
 0x1d4   :  { %v1774_v34 = vpop.f32.mrb[0].mxu1 }
 0x1d5   :  { %v288_v35 = vadd.f32 %v1774_v34, %v194_v32  ;;  %v282_v36 = vpop.f32.mrb[1].mxu1 }
 0x1d6   :  { %v283_v37 = vadd.f32 %v282_v36, %v192_v30 }
 0x1d7   :  { %v308_v38 = vadd.f32 %v1635_v33, %v288_v35 }
 0x1d8   :  { %v307_v40 = vadd.f32 %v1635_v33, %v283_v37  ;;  %v1777_v41 = vpop.f32.mrb[2].mxu1 }
 0x1d9   :  { %v298_v42 = vadd.f32 %v1777_v41, %v198_v39  ;;  %v292_v43 = vpop.f32.mrb[3].mxu1  ;;  %v312_v46 = vmax.f32 %v308_v38, 0.0 }
 0x1da   :  { %v311_v44 = vmax.f32 %v307_v40, 0.0  ;;  %v293_v45 = vadd.f32 %v292_v43, %v196_v31 }
 0x1db   :  { %v310_v47 = vadd.f32 %v1635_v33, %v298_v42 }
 0x1dc   :  { %v309_v48 = vadd.f32 %v1635_v33, %v293_v45  ;;  %1790 = vmatprep.mubr.msk.f32.mxu0 %vm315_vm2, %v311_v44 }
 0x1dd   :  { %1791 = vmatmul.mubr.msk.f32.vlgmr.msra.gmra.mrb[8].mxu0 %vm315_vm2, %v312_v46  ;;  %v314_v50 = vmax.f32 %v310_v47, 0.0 }
 0x1de   :  { %v313_v49 = vmax.f32 %v309_v48, 0.0 }
 0x1e0   :  { %1793 = vmatprep.mubr.msk.f32.mxu0 %vm315_vm2, %v313_v49 }
 0x1e1   :  { %1794 = vmatmul.mubr.msk.f32.gmra.mrb[10].mxu0 %vm315_vm2, %v314_v50 }
 0x1e2   :  { %1818 = vmatprep.mubr.msk.f32.mxu0 %vm203_vm1, %v2159_v7 }
 0x2b0   :  { %v1792_v51 = vpop.f32.mrb[8].mxu0 }
 0x2b1   :  { %v394_v52 = vpop.f32.mrb[9].mxu0 }
 0x2b2   :  { %v1926_v53 = vpack.c.bf16 %v1792_v51, %v394_v52 }
 0x2b4   :  { %v1795_v54 = vpop.f32.mrb[10].mxu0  ;;  %1927 = vmatprep.subr.bf16.mxu1 %v1926_v53 }
 0x2b5   :  { %v404_v55 = vpop.f32.mrb[11].mxu0  ;;  %1929 = vmatpush3.bf16.msra.mxu1 %v1926_v53 }
 0x2b6   :  { %v1930_v56 = vpack.c.bf16 %v1795_v54, %v404_v55 }
 0x2b8   :  { %1931 = vmatprep.subr.bf16.mxu1 %v1930_v56 }
 0x2b9   :  { %1933 = vmatpush3.bf16.msra.mxu1 %v1930_v56 }
 0x2ba   :  { %1935 = vmatprep.subr.bf16.mxu1 %v1934_v63 }
 0x2bc   :  { %1805 = vmatmul.mubr.msk.f32.vlgmr.msra.gmra.mrb[4].mxu1 %vm203_vm1, %v2175_v20 }
 0x2bd   :  { %1807 = vmatprep.mubr.msk.f32.mxu1 %vm203_vm1, %v2179_v22  ;;  %1937 = vmatpush1.bf16.msra.mxu1 %v1936_v3  ;;  %v588_v3 = vld [vmem:[%s2409_s7] sm:$0xff] }
 0x2c0   :  { %1808 = vmatmul.mubr.msk.f32.gmra.mrb[6].mxu1 %vm203_vm1, %v2185_v23 }
 0x2c1   :  { %673 = vmatprep.mubr.f32.mxu1 %v2029_v0 }
 0x38f   :  { %v1806_v5 = vpop.f32.mrb[4].mxu1 }
 0x390   :  { %v507_v10 = vpop.f32.mrb[5].mxu1  ;;  %v513_v12 = vadd.f32 %v1806_v5, %v434_v8  ;;  %v1946_v5 = vpack.c.bf16 %v589_v4, %v588_v3  ;;  %v591_v8 = vld [vmem:[%s2409_s7 + $0x18] sm:$0xff] }
 0x391   :  { %v508_v13 = vadd.f32 %v507_v10, %v433_v9  ;;  %v592_v10 = vld [vmem:[%s2409_s7 + $0x20] sm:$0xff] }
 0x392   :  { %v533_v19 = vadd.f32 %v1644_v6, %v513_v12  ;;  %v1954_v12 = vpack.c.bf16 %v593_v11, %v592_v10 }
 0x393   :  { %v532_v14 = vadd.f32 %v1644_v6, %v508_v13  ;;  %v1809_v15 = vpop.f32.mrb[6].mxu1 }
 0x394   :  { %v517_v17 = vpop.f32.mrb[7].mxu1  ;;  %v537_v27 = vmax.f32 %v533_v19, 0.0  ;;  %v523_v28 = vadd.f32 %v1809_v15, %v436_v26 }
 0x395   :  { %v536_v21 = vmax.f32 %v532_v14, 0.0  ;;  %v518_v24 = vadd.f32 %v517_v17, %v435_v16  ;;  %v1653_v14 = vld [vmem:[%s2410_s8] ss:$0 sm:$0xff] }
 0x396   :  { %v535_v30 = vadd.f32 %v1644_v6, %v523_v28 }
 0x397   :  { %560 = vrot.lane.b32.xlu1 %v536_v21, %s2032_s6  ;;  %544 = vrot.lane.b32.xlu0 %v536_v21, %s2033_s5  ;;  %v534_v29 = vadd.f32 %v1644_v6, %v518_v24  ;;  %v590_v6 = vld [vmem:[%s2409_s7 + $0x10] sm:$0xff] }
 0x398   :  { %v539_v32 = vmax.f32 %v535_v30, 0.0  ;;  %v1950_v9 = vpack.c.bf16 %v591_v8, %v590_v6 }
 0x399   :  { %v538_v31 = vmax.f32 %v534_v29, 0.0 }
 0x39b   :  { %562 = vrot.lane.b32.xlu1 %v537_v27, %s2032_s6  ;;  %546 = vrot.lane.b32.xlu0 %v537_v27, %s2033_s5 }
 0x39f   :  { %564 = vrot.lane.b32.xlu1 %v538_v31, %s2032_s6  ;;  %548 = vrot.lane.b32.xlu0 %v538_v31, %s2033_s5 }
 0x3a3   :  { %566 = vrot.lane.b32.xlu1 %v539_v32, %s2032_s6  ;;  %550 = vrot.lane.b32.xlu0 %v539_v32, %s2033_s5 }
 0x409   :  { %v561_v33 = vpop.permute.xlu1 %560  ;;  %v545_v34 = vpop.permute.xlu0 %544 }
 0x40a   :  { %v556_v35 = vadd.f32 %v545_v34, %v536_v21 }
 0x40c   :  { %v572_v36 = vadd.f32 %v561_v33, %v556_v35 }
 0x40d   :  { %v563_v37 = vpop.permute.xlu1 %562  ;;  %v547_v38 = vpop.permute.xlu0 %546 }
 0x40e   :  { %v576_v39 = vmul.f32 0.33333334, %v572_v36  ;;  %v557_v40 = vadd.f32 %v547_v38, %v537_v27 }
 0x410   :  { %v580_v41 = vmax.f32 %v576_v39, 0.0  ;;  %v573_v42 = vadd.f32 %v563_v37, %v557_v40 }
 0x411   :  { %v565_v43 = vpop.permute.xlu1 %564  ;;  %v549_v44 = vpop.permute.xlu0 %548 }
 0x412   :  { %v577_v45 = vmul.f32 0.33333334, %v573_v42  ;;  %v558_v46 = vadd.f32 %v549_v44, %v538_v31  ;;  %1645 = vmatmul.mubr.msk.f32.vlgmr.msra.gmra.mrb[8].mxu1 %vm596_vm3, %v580_v41 }
 0x413   :  { %679 = vmatprep.mubr.f32.mxu1 %v2029_v0 }
 0x414   :  { %v581_v47 = vmax.f32 %v577_v45, 0.0  ;;  %v574_v48 = vadd.f32 %v565_v43, %v558_v46 }
 0x415   :  { %v551_v49 = vpop.permute.xlu0 %550  ;;  %v567_v52 = vpop.permute.xlu1 %566 }
 0x416   :  { %v578_v50 = vmul.f32 0.33333334, %v574_v48  ;;  %v559_v51 = vadd.f32 %v551_v49, %v539_v32  ;;  %1646 = vmatmul.mubr.msk.f32.gmra.mrb[10].mxu1 %vm596_vm3, %v581_v47  ;;  %v1081_v49 = vld [vmem:[%s2412_s10] sm:$0xff] }
 0x417   :  { %685 = vmatprep.mubr.f32.mxu1 %v2029_v0 }
 0x418   :  { %v582_v53 = vmax.f32 %v578_v50, 0.0  ;;  %v575_v54 = vadd.f32 %v567_v52, %v559_v51  ;;  %v1082_v50 = vld [vmem:[%s2412_s10 + $0x8] sm:$0xff]  ;;  %v1662_v51 = vld [vmem:[%s2411_s9] ss:$0 sm:$0xff]  ;;  %s2034_s9 = smov 104  }
 0x41a   :  { %v579_v55 = vmul.f32 0.33333334, %v575_v54  ;;  %1647 = vmatmul.mubr.msk.f32.gmra.mrb[12].mxu1 %vm596_vm3, %v582_v53  ;;  %v1966_v54 = vpack.c.bf16 %v1082_v50, %v1081_v49 }
 0x41b   :  { %691 = vmatprep.mubr.f32.mxu1 %v2029_v0 }
 0x41c   :  { %v583_v56 = vmax.f32 %v579_v55, 0.0 }
 0x41e   :  { %1648 = vmatmul.mubr.msk.f32.gmra.mrb[14].mxu1 %vm596_vm3, %v583_v56 }
 0x41f   :  { %1850 = vmatprep.mubr.msk.f32.mxu1 %vm203_vm1, %v2159_v7 }
 0x4e5   :  { %v675_v57 = vpop.f32.mrb[8].mxu1 }
 0x4e6   :  { %702 = vrot.lane.b32.xlu0 %v675_v57, %s2030_s0  ;;  %v677_v58 = vpop.f32.mrb[9].mxu1 }
 0x4e9   :  { %v681_v59 = vpop.f32.mrb[10].mxu1 }
 0x4ea   :  { %v1938_v60 = vpack.c.bf16 %v681_v59, %v675_v57  ;;  %704 = vrot.lane.b32.xlu1 %v681_v59, %s2030_s0  ;;  %v683_v61 = vpop.f32.mrb[11].mxu1 }
 0x4ec   :  { %1939 = vmatprep.subr.bf16.mxu0 %v1938_v60 }
 0x4ed   :  { %v687_v62 = vpop.f32.mrb[12].mxu1  ;;  %1941 = vmatpush3.bf16.msra.mxu0 %v1938_v60 }
 0x4ee   :  { %706 = vrot.lane.b32.xlu0 %v687_v62, %s2030_s0  ;;  %v689_v0 = vpop.f32.mrb[13].mxu1 }
 0x4f1   :  { %v693_v63 = vpop.f32.mrb[14].mxu1 }
 0x4f2   :  { %v1942_v1 = vpack.c.bf16 %v693_v63, %v687_v62  ;;  %914 = vrot.lane.b32.xlu0 %v675_v57, %s2031_s17  ;;  %708 = vrot.lane.b32.xlu1 %v693_v63, %s2030_s0  ;;  %v695_v2 = vpop.f32.mrb[15].mxu1 }
 0x4f4   :  { %1943 = vmatprep.subr.bf16.mxu0 %v1942_v1 }
 0x4f5   :  { %1945 = vmatpush3.bf16.msra.mxu0 %v1942_v1 }
 0x4f6   :  { %918 = vrot.lane.b32.xlu0 %v681_v59, %s2031_s17  ;;  %916 = vrot.lane.b32.xlu1 %v677_v58, %s2031_s17 }
 0x4f7   :  { %1947 = vmatprep.subr.bf16.mxu0 %v1946_v5 }
 0x4f8   :  { %1819 = vmatmul.mubr.msk.f32.vlgmr.msra.gmra.mrb[12].mxu0 %vm203_vm1, %v2175_v20 }
 0x4f9   :  { %1821 = vmatprep.mubr.msk.f32.mxu0 %vm203_vm1, %v2179_v22  ;;  %1949 = vmatpush3.bf16.msra.mxu0 %v1946_v5 }
 0x4fa   :  { %922 = vrot.lane.b32.xlu0 %v687_v62, %s2031_s17  ;;  %920 = vrot.lane.b32.xlu1 %v683_v61, %s2031_s17 }
 0x4fb   :  { %1951 = vmatprep.subr.bf16.mxu0 %v1950_v9 }
 0x4fc   :  { %1822 = vmatmul.mubr.msk.f32.gmra.mrb[14].mxu0 %vm203_vm1, %v2185_v23 }
 0x4fd   :  { %1953 = vmatpush3.bf16.msra.mxu0 %v1950_v9 }
 0x4fe   :  { %926 = vrot.lane.b32.xlu0 %v693_v63, %s2031_s17  ;;  %924 = vrot.lane.b32.xlu1 %v689_v0, %s2031_s17 }
 0x4ff   :  { %1955 = vmatprep.subr.bf16.mxu0 %v1954_v12 }
 0x501   :  { %1957 = vmatpush3.bf16.msra.mxu0 %v1954_v12 }
 0x502   :  { %928 = vrot.lane.b32.xlu1 %v695_v2, %s2031_s17  ;;  %1967 = vmatprep.subr.bf16.mxu0 %v1966_v54 }
 0x558   :  { %v703_v16 = vpop.permute.xlu0 %702 }
 0x55c   :  { %v705_v13 = vpop.permute.xlu1 %704 }
 0x560   :  { %v707_v27 = vpop.permute.xlu0 %706 }
 0x564   :  { %v709_v24 = vpop.permute.xlu1 %708  ;;  %v915_v44 = vpop.permute.xlu0 %914 }
 0x568   :  { %v917_v43 = vpop.permute.xlu1 %916  ;;  %v919_v46 = vpop.permute.xlu0 %918 }
 0x569   :  { %v930_v57 = vsel %vm203_vm1, %v915_v44, %v917_v43 }
 0x56c   :  { %v921_v45 = vpop.permute.xlu1 %920  ;;  %v923_v48 = vpop.permute.xlu0 %922 }
 0x56d   :  { %v931_v52 = vsel %vm203_vm1, %v919_v46, %v921_v45  ;;  %v1083_v45 = vld [vmem:[%s2413_s11] sm:$0xff]  ;;  %v1084_v46 = vld [vmem:[%s2413_s11 + $0x8] sm:$0xff] }
 0x570   :  { %v925_v47 = vpop.permute.xlu1 %924  ;;  %v927_v60 = vpop.permute.xlu0 %926 }
 0x571   :  { %v932_v3 = vsel %vm203_vm1, %v923_v48, %v925_v47  ;;  %v1978_v47 = vpack.c.bf16 %v1084_v46, %v1083_v45  ;;  %v1085_v48 = vld [vmem:[%s2413_s11 + $0x10] sm:$0xff] }
 0x574   :  { %v929_v55 = vpop.permute.xlu1 %928 }
 0x575   :  { %v933_v0 = vsel %vm203_vm1, %v927_v60, %v929_v55 }
 0x5cb   :  { %v1820_v15 = vpop.f32.mrb[12].mxu0 }
 0x5cc   :  { %v786_v17 = vadd.f32 %v1820_v15, %v705_v13  ;;  %v780_v18 = vpop.f32.mrb[13].mxu0 }
 0x5cd   :  { %v781_v19 = vadd.f32 %v780_v18, %v703_v16 }
 0x5ce   :  { %v806_v21 = vadd.f32 %v1653_v14, %v786_v17 }
 0x5cf   :  { %v805_v25 = vadd.f32 %v1653_v14, %v781_v19  ;;  %v1823_v26 = vpop.f32.mrb[14].mxu0 }
 0x5d0   :  { %v796_v28 = vadd.f32 %v1823_v26, %v709_v24  ;;  %v790_v29 = vpop.f32.mrb[15].mxu0  ;;  %v810_v32 = vmax.f32 %v806_v21, 0.0 }
 0x5d1   :  { %v809_v30 = vmax.f32 %v805_v25, 0.0  ;;  %v791_v31 = vadd.f32 %v790_v29, %v707_v27 }
 0x5d2   :  { %v808_v33 = vadd.f32 %v1653_v14, %v796_v28 }
 0x5d3   :  { %v807_v34 = vadd.f32 %v1653_v14, %v791_v31  ;;  %1836 = vmatprep.mubr.msk.f32.mxu0 %vm315_vm2, %v809_v30 }
 0x5d4   :  { %1837 = vmatmul.mubr.msk.f32.vlgmr.msra.gmra.mrb[16].mxu0 %vm315_vm2, %v810_v32  ;;  %v812_v36 = vmax.f32 %v808_v33, 0.0 }
 0x5d5   :  { %v811_v35 = vmax.f32 %v807_v34, 0.0  ;;  %1969 = vmatpush3.bf16.msra.mxu0 %v1966_v54 }
 0x5d6   :  { %1979 = vmatprep.subr.bf16.mxu0 %v1978_v47 }
 0x5d7   :  { %1839 = vmatprep.mubr.msk.f32.mxu0 %vm315_vm2, %v811_v35 }
 0x5d8   :  { %1840 = vmatmul.mubr.msk.f32.gmra.mrb[18].mxu0 %vm315_vm2, %v812_v36 }
 0x6a7   :  { %v1838_v37 = vpop.f32.mrb[16].mxu0 }
 0x6a8   :  { %v891_v38 = vpop.f32.mrb[17].mxu0 }
 0x6a9   :  { %v1958_v39 = vpack.c.bf16 %v1838_v37, %v891_v38 }
 0x6ab   :  { %v1841_v40 = vpop.f32.mrb[18].mxu0  ;;  %1959 = vmatprep.subr.bf16.mxu1 %v1958_v39 }
 0x6ac   :  { %v901_v41 = vpop.f32.mrb[19].mxu0  ;;  %1961 = vmatpush3.bf16.msra.mxu1 %v1958_v39 }
 0x6ad   :  { %v1962_v42 = vpack.c.bf16 %v1841_v40, %v901_v41 }
 0x6af   :  { %1963 = vmatprep.subr.bf16.mxu1 %v1962_v42 }
 0x6b0   :  { %1965 = vmatpush3.bf16.msra.mxu1 %v1962_v42 }
 0x6b3   :  { %1851 = vmatmul.mubr.msk.f32.vlgmr.msra.gmra.mrb[16].mxu1 %vm203_vm1, %v2175_v20 }
 0x6b4   :  { %1853 = vmatprep.mubr.msk.f32.mxu1 %vm203_vm1, %v2179_v22 }
 0x6b7   :  { %1854 = vmatmul.mubr.msk.f32.gmra.mrb[18].mxu1 %vm203_vm1, %v2185_v23 }
 0x6b8   :  { %1874 = vmatprep.mubr.msk.f32.mxu1 %vm203_vm1, %v2159_v7 }
 0x786   :  { %v1852_v53 = vpop.f32.mrb[16].mxu1 }
 0x787   :  { %v1010_v56 = vadd.f32 %v1852_v53, %v931_v52  ;;  %v1004_v58 = vpop.f32.mrb[17].mxu1 }
 0x788   :  { %v1005_v59 = vadd.f32 %v1004_v58, %v930_v57 }
 0x789   :  { %v1030_v61 = vadd.f32 %v1662_v51, %v1010_v56 }
 0x78a   :  { %v1029_v62 = vadd.f32 %v1662_v51, %v1005_v59  ;;  %v1855_v63 = vpop.f32.mrb[18].mxu1 }
 0x78b   :  { %v1034_v1 = vmax.f32 %v1030_v61, 0.0  ;;  %v1020_v2 = vadd.f32 %v1855_v63, %v933_v0  ;;  %v1014_v4 = vpop.f32.mrb[19].mxu1 }
 0x78c   :  { %v1033_v5 = vmax.f32 %v1029_v62, 0.0  ;;  %v1015_v6 = vadd.f32 %v1014_v4, %v932_v3 }
 0x78d   :  { %1043 = vrot.lane.b32.xlu1 %v1034_v1, %s2033_s5  ;;  %v1032_v8 = vadd.f32 %v1662_v51, %v1020_v2 }
 0x78e   :  { %1041 = vrot.lane.b32.xlu0 %v1033_v5, %s2033_s5  ;;  %v1031_v9 = vadd.f32 %v1662_v51, %v1015_v6 }
 0x78f   :  { %v1036_v10 = vmax.f32 %v1032_v8, 0.0 }
 0x790   :  { %v1035_v11 = vmax.f32 %v1031_v9, 0.0 }
 0x791   :  { %1059 = vrot.lane.b32.xlu1 %v1034_v1, %s2032_s6 }
 0x792   :  { %1057 = vrot.lane.b32.xlu0 %v1033_v5, %s2032_s6 }
 0x795   :  { %1047 = vrot.lane.b32.xlu1 %v1036_v10, %s2033_s5 }
 0x796   :  { %1045 = vrot.lane.b32.xlu0 %v1035_v11, %s2033_s5 }
 0x799   :  { %1063 = vrot.lane.b32.xlu1 %v1036_v10, %s2032_s6 }
 0x79a   :  { %1061 = vrot.lane.b32.xlu0 %v1035_v11, %s2032_s6 }
 0x7ff   :  { %v1044_v12 = vpop.permute.xlu1 %1043 }
 0x800   :  { %v1042_v13 = vpop.permute.xlu0 %1041  ;;  %v1054_v14 = vadd.f32 %v1044_v12, %v1034_v1 }
 0x801   :  { %v1053_v15 = vadd.f32 %v1042_v13, %v1033_v5 }
 0x803   :  { %v1060_v16 = vpop.permute.xlu1 %1059 }
 0x804   :  { %v1070_v17 = vadd.f32 %v1060_v16, %v1054_v14  ;;  %v1058_v18 = vpop.permute.xlu0 %1057  ;;  %v1680_v14 = vld [vmem:[%s2415_s13] ss:$0 sm:$0xff] }
 0x805   :  { %v1069_v19 = vadd.f32 %v1058_v18, %v1053_v15 }
 0x806   :  { %v1074_v21 = vmul.f32 0.33333334, %v1070_v17 }
 0x807   :  { %v1073_v24 = vmul.f32 0.33333334, %v1069_v19  ;;  %v1048_v25 = vpop.permute.xlu1 %1047 }
 0x808   :  { %v1046_v26 = vpop.permute.xlu0 %1045  ;;  %v1078_v28 = vmax.f32 %v1074_v21, 0.0  ;;  %v1056_v29 = vadd.f32 %v1048_v25, %v1036_v10 }
 0x809   :  { %v1077_v27 = vmax.f32 %v1073_v24, 0.0  ;;  %v1055_v30 = vadd.f32 %v1046_v26, %v1035_v11 }
 0x80b   :  { %v1064_v31 = vpop.permute.xlu1 %1063  ;;  %1860 = vmatprep.mubr.msk.f32.mxu0 %vm596_vm3, %v1077_v27 }
 0x80c   :  { %v1072_v32 = vadd.f32 %v1064_v31, %v1056_v29  ;;  %1861 = vmatmul.mubr.msk.f32.vlgmr.msra.gmra.mrb[20].mxu0 %vm596_vm3, %v1078_v28  ;;  %v1062_v33 = vpop.permute.xlu0 %1061 }
 0x80d   :  { %v1071_v34 = vadd.f32 %v1062_v33, %v1055_v30  ;;  %1981 = vmatpush3.bf16.msra.mxu0 %v1978_v47 }
 0x80e   :  { %v1076_v35 = vmul.f32 0.33333334, %v1072_v32  ;;  %1884 = vmatprep.subr.mxu0 %v1085_v48 }
 0x80f   :  { %v1075_v36 = vmul.f32 0.33333334, %v1071_v34 }
 0x810   :  { %v1080_v38 = vmax.f32 %v1076_v35, 0.0 }
 0x811   :  { %v1079_v37 = vmax.f32 %v1075_v36, 0.0  ;;  %1885 = vmatpush3.msra.mxu0 %v1085_v48 }
 0x813   :  { %1863 = vmatprep.mubr.msk.f32.mxu0 %vm596_vm3, %v1079_v37 }
 0x814   :  { %1864 = vmatmul.mubr.msk.f32.gmra.mrb[22].mxu0 %vm596_vm3, %v1080_v38 }
 0x8df   :  { %v1862_v39 = vpop.f32.mrb[20].mxu0 }
 0x8e0   :  { %1191 = vrot.lane.b32.xlu1 %v1862_v39, %s2034_s9  ;;  %v1166_v40 = vpop.f32.mrb[21].mxu0 }
 0x8e1   :  { %v1970_v41 = vpack.c.bf16 %v1862_v39, %v1166_v40  ;;  %1189 = vrot.lane.b32.xlu0 %v1166_v40, %s2034_s9 }
 0x8e3   :  { %1971 = vmatprep.subr.bf16.mxu1 %v1970_v41 }
 0x8e4   :  { %1973 = vmatpush3.bf16.msra.mxu1 %v1970_v41 }
 0x8e7   :  { %v1865_v42 = vpop.f32.mrb[22].mxu0 }
 0x8e8   :  { %1195 = vrot.lane.b32.xlu1 %v1865_v42, %s2034_s9  ;;  %v1176_v43 = vpop.f32.mrb[23].mxu0 }
 0x8e9   :  { %v1974_v44 = vpack.c.bf16 %v1865_v42, %v1176_v43  ;;  %1193 = vrot.lane.b32.xlu0 %v1176_v43, %s2034_s9 }
 0x8eb   :  { %1975 = vmatprep.subr.bf16.mxu1 %v1974_v44 }
 0x8ec   :  { %1400 = vrot.lane.b32.xlu1 %v1862_v39, %s2030_s0  ;;  %1977 = vmatpush3.bf16.msra.mxu1 %v1974_v44 }
 0x8ed   :  { %1398 = vrot.lane.b32.xlu0 %v1166_v40, %s2030_s0 }
 0x8ef   :  { %1875 = vmatmul.mubr.msk.f32.vlgmr.msra.gmra.mrb[20].mxu1 %vm203_vm1, %v2175_v20 }
 0x8f0   :  { %1404 = vrot.lane.b32.xlu1 %v1865_v42, %s2030_s0  ;;  %1877 = vmatprep.mubr.msk.f32.mxu1 %vm203_vm1, %v2179_v22 }
 0x8f1   :  { %1402 = vrot.lane.b32.xlu0 %v1176_v43, %s2030_s0 }
 0x8f3   :  { %1878 = vmatmul.mubr.msk.f32.gmra.mrb[22].mxu1 %vm203_vm1, %v2185_v23 }
 0x8f4   :  { %1900 = vmatprep.mubr.msk.f32.mxu1 %vm203_vm1, %v2159_v7  ;;  %v1671_v7 = vld [vmem:[%s2414_s12] ss:$0 sm:$0xff] }
 0x952   :  { %v1192_v49 = vpop.permute.xlu1 %1191 }
 0x953   :  { %v1190_v51 = vpop.permute.xlu0 %1189 }
 0x95a   :  { %v1196_v56 = vpop.permute.xlu1 %1195 }
 0x95b   :  { %v1194_v59 = vpop.permute.xlu0 %1193 }
 0x95e   :  { %v1401_v12 = vpop.permute.xlu1 %1400 }
 0x95f   :  { %v1399_v13 = vpop.permute.xlu0 %1398 }
 0x962   :  { %v1405_v21 = vpop.permute.xlu1 %1404 }
 0x9c2   :  { %v1876_v50 = vpop.f32.mrb[20].mxu1 }
 0x9c3   :  { %v1273_v52 = vadd.f32 %v1876_v50, %v1192_v49  ;;  %v1267_v53 = vpop.f32.mrb[21].mxu1 }
 0x9c4   :  { %v1268_v54 = vadd.f32 %v1267_v53, %v1190_v51 }
 0x9c5   :  { %v1293_v55 = vadd.f32 %v1671_v7, %v1273_v52 }
 0x9c6   :  { %v1292_v57 = vadd.f32 %v1671_v7, %v1268_v54  ;;  %v1879_v58 = vpop.f32.mrb[22].mxu1 }
 0x9c7   :  { %v1283_v60 = vadd.f32 %v1879_v58, %v1196_v56  ;;  %v1277_v61 = vpop.f32.mrb[23].mxu1  ;;  %v1297_v63 = vmax.f32 %v1293_v55, 0.0 }
 0x9c8   :  { %v1296_v62 = vmax.f32 %v1292_v57, 0.0  ;;  %v1278_v0 = vadd.f32 %v1277_v61, %v1194_v59 }
 0x9c9   :  { %v1295_v1 = vadd.f32 %v1671_v7, %v1283_v60 }
 0x9ca   :  { %v1294_v2 = vadd.f32 %v1671_v7, %v1278_v0  ;;  %1886 = vmatprep.mubr.msk.f32.mxu0 %vm1300_vm4, %v1296_v62 }
 0x9cb   :  { %1887 = vmatmul.mubr.msk.f32.vlgmr.msra.gmra.mrb[24].mxu0 %vm1300_vm4, %v1297_v63  ;;  %v1299_v4 = vmax.f32 %v1295_v1, 0.0 }
 0x9cc   :  { %v1298_v3 = vmax.f32 %v1294_v2, 0.0 }
 0x9ce   :  { %1889 = vmatprep.mubr.msk.f32.mxu0 %vm1300_vm4, %v1298_v3 }
 0x9cf   :  { %1890 = vmatmul.mubr.msk.f32.gmra.mrb[26].mxu0 %vm1300_vm4, %v1299_v4 }
 0xa9e   :  { %v1888_v5 = vpop.f32.mrb[24].mxu0 }
 0xa9f   :  { %v1379_v6 = vpop.f32.mrb[25].mxu0 }
 0xaa0   :  { %v1982_v8 = vpack.c.bf16 %v1888_v5, %v1379_v6 }
 0xaa2   :  { %v1891_v9 = vpop.f32.mrb[26].mxu0  ;;  %1983 = vmatprep.subr.bf16.mxu1 %v1982_v8 }
 0xaa3   :  { %v1389_v10 = vpop.f32.mrb[27].mxu0  ;;  %1985 = vmatpush3.bf16.msra.mxu1 %v1982_v8 }
 0xaa4   :  { %v1986_v11 = vpack.c.bf16 %v1891_v9, %v1389_v10 }
 0xaa6   :  { %1987 = vmatprep.subr.bf16.mxu1 %v1986_v11 }
 0xaa7   :  { %1989 = vmatpush3.bf16.msra.mxu1 %v1986_v11 }
 0xaaa   :  { %1901 = vmatmul.mubr.msk.f32.vlgmr.msra.gmra.mrb[24].mxu1 %vm203_vm1, %v2175_v20  ;;  %v1403_v20 = vpop.permute.xlu0 %1402 }
 0xaab   :  { %1903 = vmatprep.mubr.msk.f32.mxu1 %vm203_vm1, %v2179_v22 }
 0xaae   :  { %1904 = vmatmul.mubr.msk.f32.gmra.mrb[26].mxu1 %vm203_vm1, %v2185_v23 }
 0xb7d   :  { %v1902_v15 = vpop.f32.mrb[24].mxu1 }
 0xb7e   :  { %v1482_v16 = vadd.f32 %v1902_v15, %v1401_v12  ;;  %v1476_v17 = vpop.f32.mrb[25].mxu1 }
 0xb7f   :  { %v1477_v18 = vadd.f32 %v1476_v17, %v1399_v13 }
 0xb80   :  { %v1502_v19 = vadd.f32 %v1680_v14, %v1482_v16 }
 0xb81   :  { %v1905_v24 = vpop.f32.mrb[26].mxu1  ;;  %v1501_v26 = vadd.f32 %v1680_v14, %v1477_v18 }
 0xb82   :  { %v1506_v25 = vmax.f32 %v1502_v19, 0.0  ;;  %v1492_v22 = vadd.f32 %v1905_v24, %v1405_v21  ;;  %v1486_v27 = vpop.f32.mrb[27].mxu1 }
 0xb83   :  { %v1487_v28 = vadd.f32 %v1486_v27, %v1403_v20  ;;  %v1505_v23 = vmax.f32 %v1501_v26, 0.0 }
 0xb84   :  { %1531 = vrot.lane.b32.xlu0 %v1506_v25, %s2033_s5  ;;  %1515 = vrot.lane.b32.xlu1 %v1506_v25, %s2035_s28  ;;  %v1504_v29 = vadd.f32 %v1680_v14, %v1492_v22 }
 0xb85   :  { %v1503_v30 = vadd.f32 %v1680_v14, %v1487_v28  ;;  %v1681_v28 = vld [vmem:[%s2416_s14] ss:$0 sm:$0xff] }
 0xb86   :  { %v1508_v31 = vmax.f32 %v1504_v29, 0.0 }
 0xb87   :  { %v1507_v32 = vmax.f32 %v1503_v30, 0.0 }
 0xb88   :  { %1529 = vrot.lane.b32.xlu1 %v1505_v23, %s2033_s5  ;;  %1513 = vrot.lane.b32.xlu0 %v1505_v23, %s2035_s28 }
 0xb8c   :  { %1519 = vrot.lane.b32.xlu1 %v1508_v31, %s2035_s28  ;;  %1517 = vrot.lane.b32.xlu0 %v1507_v32, %s2035_s28 }
 0xb90   :  { %1535 = vrot.lane.b32.xlu1 %v1508_v31, %s2033_s5  ;;  %1533 = vrot.lane.b32.xlu0 %v1507_v32, %s2033_s5 }
 0xbf6   :  { %v1516_v33 = vpop.permute.xlu1 %1515  ;;  %v1532_v34 = vpop.permute.xlu0 %1531 }
 0xbf7   :  { %v1526_v35 = vadd.f32 %v1516_v33, %v1506_v25 }
 0xbf9   :  { %v1542_v39 = vadd.f32 %v1532_v34, %v1526_v35 }
 0xbfa   :  { %v1530_v36 = vpop.permute.xlu1 %1529  ;;  %v1514_v37 = vpop.permute.xlu0 %1513 }
 0xbfb   :  { %v1525_v38 = vadd.f32 %v1514_v37, %v1505_v23  ;;  %v1546_v44 = vmul.f32 0.33333334, %v1542_v39 }
 0xbfd   :  { %v1541_v40 = vadd.f32 %v1530_v36, %v1525_v38  ;;  %v1550_v51 = vsel %vm85_vm0, %v1546_v44, 0.0 }
 0xbfe   :  { %v1520_v41 = vpop.permute.xlu1 %1519  ;;  %v1518_v42 = vpop.permute.xlu0 %1517 }
 0xbff   :  { %v1545_v43 = vmul.f32 0.33333334, %v1541_v40  ;;  %v1528_v45 = vadd.f32 %v1520_v41, %v1508_v31  ;;  %v1527_v46 = vadd.f32 %v1518_v42, %v1507_v32  ;;  %v1682_v32 = vld [vmem:[%s2417_s15] ss:$0 sm:$0xff] }
 0xc01   :  { %v1549_v49 = vsel %vm85_vm0, %v1545_v43, 0.0 }
 0xc02   :  { %v1536_v47 = vpop.permute.xlu1 %1535  ;;  %v1534_v48 = vpop.permute.xlu0 %1533  ;;  %v1551_v54 = vadd.f32 %v1550_v51, %v1549_v49 }
 0xc03   :  { %v1544_v7 = vadd.f32 %v1536_v47, %v1528_v45  ;;  %v1543_v50 = vadd.f32 %v1534_v48, %v1527_v46 }
 0xc05   :  { %v1548_v52 = vmul.f32 0.33333334, %v1544_v7  ;;  %v1547_v53 = vmul.f32 0.33333334, %v1543_v50 }
 0xc07   :  { %v1552_v55 = vsel %vm85_vm0, %v1547_v53, 0.0  ;;  %v1554_v57 = vsel %vm85_vm0, %v1548_v52, 0.0 }
 0xc08   :  { %v1553_v56 = vadd.f32 %v1552_v55, %v1551_v54 }
 0xc0a   :  { %v1555_v58 = vadd.f32 %v1554_v57, %v1553_v56 }
 0xc0c   :  { %v1556_v59 = vrot.slane %v1555_v58, 4 }
 0xc0e   :  { %v1557_v60 = vadd.f32 %v1556_v59, %v1555_v58 }
 0xc10   :  { %v1558_v61 = vrot.slane %v1557_v60, 2 }
 0xc12   :  { %v1559_v62 = vadd.f32 %v1558_v61, %v1557_v60 }
 0xc14   :  { %v1560_v0 = vrot.slane %v1559_v62, 1 }
 0xc16   :  { %v1561_v63 = vadd.f32 %v1560_v0, %v1559_v62 }
 0xc18   :  { %v1563_v1 = vmul.f32 0.03125, %v1561_v63 }
 0xc1a   :  { %v1564_v2 = vsub.f32 %v1545_v43, %v1563_v1  ;;  %v1565_v3 = vsub.f32 %v1546_v44, %v1563_v1  ;;  %v1566_v4 = vsub.f32 %v1547_v53, %v1563_v1  ;;  %v1567_v5 = vsub.f32 %v1548_v52, %v1563_v1 }
 0xc1c   :  { %v1568_v6 = vmul.f32 %v1564_v2, %v1564_v2  ;;  %v1569_v8 = vmul.f32 %v1565_v3, %v1565_v3  ;;  %v1570_v9 = vmul.f32 %v1566_v4, %v1566_v4  ;;  %v1571_v10 = vmul.f32 %v1567_v5, %v1567_v5 }
 0xc1e   :  { %v1572_v11 = vsel %vm85_vm0, %v1568_v6, 0.0  ;;  %v1573_v12 = vsel %vm85_vm0, %v1569_v8, 0.0  ;;  %v1575_v14 = vsel %vm85_vm0, %v1570_v9, 0.0  ;;  %v1577_v16 = vsel %vm85_vm0, %v1571_v10, 0.0 }
 0xc1f   :  { %v1574_v13 = vadd.f32 %v1573_v12, %v1572_v11 }
 0xc21   :  { %v1576_v15 = vadd.f32 %v1575_v14, %v1574_v13 }
 0xc23   :  { %v1578_v17 = vadd.f32 %v1577_v16, %v1576_v15 }
 0xc25   :  { %v1579_v18 = vrot.slane %v1578_v17, 4 }
 0xc27   :  { %v1580_v19 = vadd.f32 %v1579_v18, %v1578_v17 }
 0xc29   :  { %v1581_v21 = vrot.slane %v1580_v19, 2 }
 0xc2b   :  { %v1582_v24 = vadd.f32 %v1581_v21, %v1580_v19 }
 0xc2d   :  { %v1583_v20 = vrot.slane %v1582_v24, 1 }
 0xc2f   :  { %v1584_v25 = vadd.f32 %v1583_v20, %v1582_v24 }
 0xc31   :  { %v1585_v26 = vmul.f32 0.03125, %v1584_v25 }
 0xc33   :  { %v1586_v22 = vadd.f32 1e-05, %v1585_v26 }
 0xc35   :  { %2000 = vrsqrt.f32 %v1586_v22 }
 0xc3f   :  { %v2001_v27 = vpop.eup %2000 }
 0xc40   :  { %v1588_v23 = vmul.f32 %v2001_v27, %v1564_v2  ;;  %v1589_v29 = vmul.f32 %v2001_v27, %v1565_v3  ;;  %v1590_v30 = vmul.f32 %v2001_v27, %v1566_v4  ;;  %v1591_v31 = vmul.f32 %v2001_v27, %v1567_v5 }
 0xc42   :  { %v1599_v33 = vmul.f32 %v1681_v28, %v1588_v23  ;;  %v1600_v34 = vmul.f32 %v1681_v28, %v1589_v29  ;;  %v1601_v35 = vmul.f32 %v1681_v28, %v1590_v30  ;;  %v1602_v36 = vmul.f32 %v1681_v28, %v1591_v31 }
 0xc44   :  { %v1610_v37 = vadd.f32 %v1682_v32, %v1599_v33  ;;  %v1611_v38 = vadd.f32 %v1682_v32, %v1600_v34  ;;  %v1612_v39 = vadd.f32 %v1682_v32, %v1601_v35  ;;  %v1613_v40 = vadd.f32 %v1682_v32, %v1602_v36 }
 0xc46   :  { %v1614_v41 = vmax.f32 %v1610_v37, 0.0  ;;  %v1615_v42 = vmax.f32 %v1611_v38, 0.0  ;;  %v1616_v43 = vmax.f32 %v1612_v39, 0.0  ;;  %v1617_v44 = vmax.f32 %v1613_v40, 0.0 }
 0xc48   :  { %1618 = vst.msk [vmem:[%s2418_s16] sm:$0xff] %vm85_vm0, %v1614_v41  ;;  %1619 = vst.msk [vmem:[%s2418_s16 + $0x8] sm:$0xff] %vm85_vm0, %v1615_v42 }
 0xc49   :  { %1620 = vst.msk [vmem:[%s2418_s16 + $0x10] sm:$0xff] %vm85_vm0, %v1616_v43  ;;  %1621 = vst.msk [vmem:[%s2418_s16 + $0x18] sm:$0xff] %vm85_vm0, %v1617_v44 }
 0xc4a   :  { %1626 = vsyncpa [#allocation3], 1 }

</bundles_post_ra>
